<compile_context>
chip_gen: v7x
topology: tpu7x:2x2x1
jax: 0.10.0
libtpu: 0.0.40
codegen_flags: <defaults>
</compile_context>

<pallas_src>
import functools
import math

import jax
import jax.numpy as jnp
from jax.experimental import pallas as pl
from jax.experimental.pallas import tpu as pltpu


# ------------------------------ small helpers ------------------------------ #

def _round_up(x, m):
    return (x + m - 1) // m * m


def _choose_tiles(M, N):
    """Split exactly one axis in two (lane/sublane aligned) so v7x megacore
    gets 2 parallel blocks while keeping the grid at <=2 steps."""
    tn = N // 2 if (N >= 256 and (N // 2) % 128 == 0) else N
    if tn == N:
        tm = M // 2 if (M >= 16 and (M // 2) % 8 == 0) else M
    else:
        tm = M
    return tm, tn


_VMEM_LIMIT = 32 * 1024 * 1024


# --------------------- kernel 1: full-K GEMM (+bias, ReLU) ------------------ #

def _gemm_kernel(a_ref, w_ref, s_ref, o_ref, *, activation):
    y = jnp.dot(a_ref[...], w_ref[...], preferred_element_type=jnp.float32)
    y = y + s_ref[...]
    if activation == "relu":
        y = jnp.maximum(y, 0.0)
    o_ref[...] = y.astype(o_ref.dtype)


def pallas_matmul(a, w, shift, activation=None, out_dtype=jnp.bfloat16):
    """act((a @ w) + shift). a: (M, K) bf16, w: (K, N) bf16 pre-padded,
    shift: (1, N) f32. Full-K blocks, grid of at most 2 steps."""
    M, K = a.shape
    K2, N = w.shape
    assert K == K2, (K, K2)
    tm, tn = _choose_tiles(M, N)
    grid = (M // tm, N // tn)
    return pl.pallas_call(
        functools.partial(_gemm_kernel, activation=activation),
        out_shape=jax.ShapeDtypeStruct((M, N), out_dtype),
        grid=grid,
        in_specs=[
            pl.BlockSpec((tm, K), lambda i, j: (i, 0)),
            pl.BlockSpec((K, tn), lambda i, j: (0, j)),
            pl.BlockSpec((1, tn), lambda i, j: (0, j)),
        ],
        out_specs=pl.BlockSpec((tm, tn), lambda i, j: (i, j)),
        compiler_params=pltpu.CompilerParams(
            dimension_semantics=("parallel", "parallel"),
            vmem_limit_bytes=_VMEM_LIMIT),
    )(a, w, shift)


# ------------- kernel 2: GEMM + bias + residual + LayerNorm (fused) --------- #

def _gemm_res_ln_kernel(a_ref, w_ref, bias_ref, res_ref, g_ref, b_ref, o_ref,
                        *, eps):
    z = jnp.dot(a_ref[...], w_ref[...], preferred_element_type=jnp.float32)
    z = z + bias_ref[...] + res_ref[...].astype(jnp.float32)
    mu = jnp.mean(z, axis=-1, keepdims=True)
    c = z - mu
    var = jnp.mean(c * c, axis=-1, keepdims=True)
    y = c * jax.lax.rsqrt(var + eps) * g_ref[...] + b_ref[...]
    o_ref[...] = y.astype(o_ref.dtype)


def pallas_matmul_res_ln(a, w, bias, residual, gamma, beta, eps=1e-5,
                         out_dtype=jnp.bfloat16):
    """LayerNorm((a @ w + bias) + residual) over the last axis."""
    M, K = a.shape
    K2, N = w.shape
    assert K == K2 and N % 128 == 0
    tm = M // 2 if (M >= 16 and (M // 2) % 8 == 0) else M
    grid = (M // tm,)
    return pl.pallas_call(
        functools.partial(_gemm_res_ln_kernel, eps=eps),
        out_shape=jax.ShapeDtypeStruct((M, N), out_dtype),
        grid=grid,
        in_specs=[
            pl.BlockSpec((tm, K), lambda i: (i, 0)),
            pl.BlockSpec((K, N), lambda i: (0, 0)),
            pl.BlockSpec((1, N), lambda i: (0, 0)),
            pl.BlockSpec((tm, N), lambda i: (i, 0)),
            pl.BlockSpec((1, N), lambda i: (0, 0)),
            pl.BlockSpec((1, N), lambda i: (0, 0)),
        ],
        out_specs=pl.BlockSpec((tm, N), lambda i: (i, 0)),
        compiler_params=pltpu.CompilerParams(
            dimension_semantics=("parallel",),
            vmem_limit_bytes=_VMEM_LIMIT),
    )(a, w, bias, residual, gamma, beta)


# --------- kernel 3: GEMM + residual + LayerNorm + classifier (fused) ------- #

def _gemm_res_ln_cls_kernel(a_ref, w_ref, bias_ref, res_ref, g_ref, b_ref,
                            cw_ref, cb_ref, o_ref, *, eps):
    z = jnp.dot(a_ref[...], w_ref[...], preferred_element_type=jnp.float32)
    z = z + bias_ref[...] + res_ref[...].astype(jnp.float32)
    mu = jnp.mean(z, axis=-1, keepdims=True)
    c = z - mu
    var = jnp.mean(c * c, axis=-1, keepdims=True)
    y = c * jax.lax.rsqrt(var + eps) * g_ref[...] + b_ref[...]
    logits = jnp.dot(y.astype(cw_ref.dtype), cw_ref[...],
                     preferred_element_type=jnp.float32) + cb_ref[...]
    o_ref[...] = logits.astype(o_ref.dtype)


def pallas_matmul_res_ln_cls(a, w, bias, residual, gamma, beta, cls_w, cls_b,
                             eps=1e-5):
    """(LayerNorm((a @ w + bias) + residual)) @ cls_w + cls_b  -> f32 logits."""
    M, K = a.shape
    K2, N = w.shape
    _, NC = cls_w.shape
    assert K == K2 and N % 128 == 0 and NC % 128 == 0
    tm = M // 2 if (M >= 16 and (M // 2) % 8 == 0) else M
    grid = (M // tm,)
    return pl.pallas_call(
        functools.partial(_gemm_res_ln_cls_kernel, eps=eps),
        out_shape=jax.ShapeDtypeStruct((M, NC), jnp.float32),
        grid=grid,
        in_specs=[
            pl.BlockSpec((tm, K), lambda i: (i, 0)),
            pl.BlockSpec((K, N), lambda i: (0, 0)),
            pl.BlockSpec((1, N), lambda i: (0, 0)),
            pl.BlockSpec((tm, N), lambda i: (i, 0)),
            pl.BlockSpec((1, N), lambda i: (0, 0)),
            pl.BlockSpec((1, N), lambda i: (0, 0)),
            pl.BlockSpec((N, NC), lambda i: (0, 0)),
            pl.BlockSpec((1, NC), lambda i: (0, 0)),
        ],
        out_specs=pl.BlockSpec((tm, NC), lambda i: (i, 0)),
        compiler_params=pltpu.CompilerParams(
            dimension_semantics=("parallel",),
            vmem_limit_bytes=_VMEM_LIMIT),
    )(a, w, bias, residual, gamma, beta, cls_w, cls_b)


# -------------- kernel 4: multi-head self-attention (per batch) ------------- #

def _attention_kernel(qkv_ref, m_ref, o_ref, *, n_heads, emb, scale):
    qkv = qkv_ref[0]                    # (S, 3E) bf16, resident in VMEM
    mask = m_ref[...]                   # (1, S) additive key-padding mask, f32
    dh = emb // n_heads
    outs = []
    for h in range(n_heads):            # static unroll; Dh=64 slices of VMEM tile
        q = qkv[:, h * dh:(h + 1) * dh]
        k = qkv[:, emb + h * dh:emb + (h + 1) * dh]
        v = qkv[:, 2 * emb + h * dh:2 * emb + (h + 1) * dh]
        s = jax.lax.dot_general(q, k, (((1,), (1,)), ((), ())),
                                preferred_element_type=jnp.float32)
        s = s * scale + mask            # broadcast (1,S) over queries
        s_max = jnp.max(s, axis=-1, keepdims=True)
        p = jnp.exp(s - s_max)
        denom = jnp.sum(p, axis=-1, keepdims=True)
        p = p * pl.reciprocal(denom, approx=True)
        outs.append(jnp.dot(p.astype(qkv.dtype), v,
                            preferred_element_type=jnp.float32))
    # One lane-dense (S, E) store (no XLA head merge afterwards).
    o_ref[0] = jnp.concatenate(outs, axis=-1).astype(o_ref.dtype)


def pallas_attention(qkv, add_mask, n_heads, out_dtype=jnp.bfloat16):
    """qkv: (B, S, 3E) bf16 straight from in_proj; add_mask: (B, S) f32."""
    B, S, threeE = qkv.shape
    E = threeE // 3
    dh = E // n_heads
    scale = 1.0 / math.sqrt(dh)
    return pl.pallas_call(
        functools.partial(_attention_kernel, n_heads=n_heads, emb=E,
                          scale=scale),
        out_shape=jax.ShapeDtypeStruct((B, S, E), out_dtype),
        grid=(B,),
        in_specs=[
            pl.BlockSpec((1, S, threeE), lambda b: (b, 0, 0)),
            pl.BlockSpec((1, S), lambda b: (b, 0)),
        ],
        out_specs=pl.BlockSpec((1, S, E), lambda b: (b, 0, 0)),
        compiler_params=pltpu.CompilerParams(
            dimension_semantics=("parallel",)),
    )(qkv, add_mask)


# ------------------------------ JAX glue code ------------------------------ #

def im2col_nhwc(x, k, stride, pad):
    """x: (N, H, W, C) -> (N*Ho*Wo, k*k*C) rows, column order (kh, kw, cin)."""
    N, H, W, C = x.shape
    xp = jnp.pad(x, ((0, 0), (pad, pad), (pad, pad), (0, 0)))
    Ho = (H + 2 * pad - k) // stride + 1
    Wo = (W + 2 * pad - k) // stride + 1
    patches = []
    for dh in range(k):
        for dw in range(k):
            patches.append(
                xp[:, dh:dh + Ho * stride:stride, dw:dw + Wo * stride:stride, :])
    cols = jnp.stack(patches, axis=3)               # (N, Ho, Wo, k*k, C)
    cols = cols.reshape(N * Ho * Wo, k * k * C)
    return cols, Ho, Wo


def init_params(key, height, width, kernel_size=3, emb_size=768,
                channels=(1, 64, 128, 256), ffn=3072):
    keys = iter(jax.random.split(key, 32))
    p = {"convs": []}
    for i in range(len(channels) - 1):
        cin, cout = channels[i], channels[i + 1]
        fan_in = cin * kernel_size * kernel_size
        p["convs"].append(dict(
            w=jax.random.normal(next(keys), (cout, cin, kernel_size, kernel_size),
                                jnp.float32) / math.sqrt(fan_in),
            gamma=1.0 + 0.01 * jax.random.normal(next(keys), (cout,), jnp.float32),
            beta=0.01 * jax.random.normal(next(keys), (cout,), jnp.float32),
            mean=jnp.zeros((cout,), jnp.float32),
            var=jnp.ones((cout,), jnp.float32),
        ))
    n_down = len(channels) - 1
    flat = channels[-1] * (height // 2 ** n_down) * (width // 2 ** n_down)
    E = emb_size
    p["emb_w"] = 0.02 * jax.random.normal(next(keys), (E, flat), jnp.float32)
    p["emb_b"] = jnp.zeros((E,), jnp.float32)
    p["in_proj_w"] = 0.02 * jax.random.normal(next(keys), (3 * E, E), jnp.float32)
    p["in_proj_b"] = jnp.zeros((3 * E,), jnp.float32)
    p["out_proj_w"] = 0.02 * jax.random.normal(next(keys), (E, E), jnp.float32)
    p["out_proj_b"] = jnp.zeros((E,), jnp.float32)
    p["ln1_g"] = jnp.ones((E,), jnp.float32)
    p["ln1_b"] = jnp.zeros((E,), jnp.float32)
    p["lin1_w"] = 0.02 * jax.random.normal(next(keys), (ffn, E), jnp.float32)
    p["lin1_b"] = jnp.zeros((ffn,), jnp.float32)
    p["lin2_w"] = 0.02 * jax.random.normal(next(keys), (E, ffn), jnp.float32)
    p["lin2_b"] = jnp.zeros((E,), jnp.float32)
    p["ln2_g"] = jnp.ones((E,), jnp.float32)
    p["ln2_b"] = jnp.zeros((E,), jnp.float32)
    p["cls_w"] = 0.02 * jax.random.normal(next(keys), (1, E), jnp.float32)
    p["cls_b"] = jnp.zeros((1,), jnp.float32)
    return p


def prepare_params(p, *, kernel_size=3, eps=1e-5):
    """One-time weight prep: fold eval-BN into conv weights, reorder to im2col
    (kh,kw,cin,cout), pad channels to lane multiples, transpose Linear weights,
    and cast everything the MXU touches to bf16. Runs once, outside forward."""
    k = kernel_size
    prep = {"convs": []}
    prev_c = p["convs"][0]["w"].shape[1]            # input channels (=1)
    for conv in p["convs"]:
        cout, cin = conv["w"].shape[:2]
        scale = conv["gamma"] / jnp.sqrt(conv["var"] + eps)
        shift = conv["beta"] - conv["mean"] * scale
        w = (conv["w"] * scale[:, None, None, None]).transpose(2, 3, 1, 0)
        cout_pad = _round_up(cout, 128)
        # pad cin up to the (padded) channel count flowing in from the previous
        # layer (those activations are exactly zero), pad cout for lane density.
        w = jnp.pad(w, ((0, 0), (0, 0), (0, prev_c - cin), (0, cout_pad - cout)))
        w = w.reshape(k * k * prev_c, cout_pad).astype(jnp.bfloat16)
        shift = jnp.pad(shift, (0, cout_pad - cout)).reshape(1, cout_pad)
        prep["convs"].append({"w": w, "shift": shift.astype(jnp.float32)})
        prev_c = cout_pad
    # NOTE: last conv's cout (256) is already a multiple of 128, so the NHWC
    # flatten feeding emb_w contains no padded channels.
    prep["emb_w"] = p["emb_w"].T.astype(jnp.bfloat16)            # (flat, E)
    prep["emb_b"] = p["emb_b"].reshape(1, -1).astype(jnp.float32)
    prep["in_proj_w"] = p["in_proj_w"].T.astype(jnp.bfloat16)    # (E, 3E)
    prep["in_proj_b"] = p["in_proj_b"].reshape(1, -1).astype(jnp.float32)
    prep["out_proj_w"] = p["out_proj_w"].T.astype(jnp.bfloat16)  # (E, E)
    prep["out_proj_b"] = p["out_proj_b"].reshape(1, -1).astype(jnp.float32)
    prep["lin1_w"] = p["lin1_w"].T.astype(jnp.bfloat16)          # (E, ffn)
    prep["lin1_b"] = p["lin1_b"].reshape(1, -1).astype(jnp.float32)
    prep["lin2_w"] = p["lin2_w"].T.astype(jnp.bfloat16)          # (ffn, E)
    prep["lin2_b"] = p["lin2_b"].reshape(1, -1).astype(jnp.float32)
    for n in ("ln1_g", "ln1_b", "ln2_g", "ln2_b"):
        prep[n] = p[n].reshape(1, -1).astype(jnp.float32)
    E = p["cls_w"].shape[1]
    cls_w = jnp.zeros((E, 128), jnp.float32).at[:, 0].set(p["cls_w"][0])
    prep["cls_w"] = cls_w.astype(jnp.bfloat16)                   # (E, 128)
    prep["cls_b"] = jnp.zeros((1, 128), jnp.float32).at[0, 0].set(p["cls_b"][0])
    return prep


def forward(prep, slices, words_mask, *, kernel_size=3, n_heads=12):
    """slices: (B, S, H, W) f32; words_mask: (B, S) bool, True = padded key."""
    B, S, H, W = slices.shape

    # ---- VisualEmbedderSL: 3x [conv(s=2) + BN(folded) + ReLU] as im2col GEMMs,
    #      activations stay NHWC bf16 between layers.
    x = slices.reshape(B * S, H, W, 1).astype(jnp.bfloat16)
    for conv in prep["convs"]:
        cols, Ho, Wo = im2col_nhwc(x, kernel_size, 2, kernel_size // 2)
        y = pallas_matmul(cols, conv["w"], conv["shift"], activation="relu",
                          out_dtype=jnp.bfloat16)
        x = y.reshape(B * S, Ho, Wo, -1)
    flat = x.reshape(B * S, -1)                                   # (B*S, 1024)
    emb = pallas_matmul(flat, prep["emb_w"], prep["emb_b"],
                        out_dtype=jnp.bfloat16)                   # (B*S, E)

    # ---- TransformerEncoderLayer (post-norm, ReLU FFN, dropout=0 -> identity).
    E = prep["emb_w"].shape[1]
    qkv = pallas_matmul(emb, prep["in_proj_w"], prep["in_proj_b"],
                        out_dtype=jnp.bfloat16)                   # (B*S, 3E)
    qkv = qkv.reshape(B, S, 3 * E)                                # free reshape

    add_mask = jnp.where(words_mask, -1e9, 0.0).astype(jnp.float32)   # (B, S)
    attn = pallas_attention(qkv, add_mask, n_heads)               # (B, S, E)
    attn2d = attn.reshape(B * S, E)

    # Fused: out_proj GEMM + residual + LayerNorm1
    h1 = pallas_matmul_res_ln(attn2d, prep["out_proj_w"], prep["out_proj_b"],
                              emb, prep["ln1_g"], prep["ln1_b"])

    ff = pallas_matmul(h1, prep["lin1_w"], prep["lin1_b"], activation="relu",
                       out_dtype=jnp.bfloat16)                    # (B*S, 3072)

    # Fused: lin2 GEMM + residual + LayerNorm2 + class predictor (Linear(E,1)),
    # logits come out in lane 0 of a 128-lane padded output.
    logits = pallas_matmul_res_ln_cls(ff, prep["lin2_w"], prep["lin2_b"],
                                      h1, prep["ln2_g"], prep["ln2_b"],
                                      prep["cls_w"], prep["cls_b"])
    return logits[:, 0].reshape(B, S)


# --------------------------------- driver ---------------------------------- #

if __name__ == "__main__":
    key = jax.random.PRNGKey(0)
    kp, kx = jax.random.split(key)

    B, S, Himg, Wimg = 2, 8, 16, 16
    raw = init_params(kp, Himg, Wimg, kernel_size=3, emb_size=768,
                      channels=(1, 64, 128, 256), ffn=3072)
    params = prepare_params(raw, kernel_size=3)     # one-time fold/cast/pad

    slices = jax.random.normal(kx, (B, S, Himg, Wimg), jnp.float32)
    # PyTorch src_key_padding_mask semantics: True = padded (ignored) position.
    words_mask = jnp.zeros((B, S), dtype=bool).at[1, -3:].set(True)

    out = forward(params, slices, words_mask, kernel_size=3, n_heads=12)
    out = jax.block_until_ready(out)
    assert out.shape == (B, S) and out.dtype == jnp.float32
    assert bool(jnp.all(jnp.isfinite(out)))
    print("KERNEL_OK")
</pallas_src>

<mosaic_0001>
module attributes {stable_mosaic.version = 11 : i64} {
  func.func @_gemm_kernel(%arg0: i32, %arg1: i32, %arg2: memref<512x9xbf16, #tpu.memory_space<vmem>>, %arg3: memref<9x128xbf16, #tpu.memory_space<vmem>>, %arg4: memref<1x128xf32, #tpu.memory_space<vmem>>, %arg5: memref<512x128xbf16, #tpu.memory_space<vmem>>) attributes {dimension_semantics = [#tpu.dimension_semantics<parallel>, #tpu.dimension_semantics<parallel>], iteration_bounds = array<i64: 2, 1>, scalar_prefetch = 0 : i64, scratch_operands = 0 : i64, tpu.core_type = #tpu.core_type<tc>, window_params = [{transform_indices = @transform_0, window_bounds = array<i64: 512, 9>}, {transform_indices = @transform_1, window_bounds = array<i64: 9, 128>}, {transform_indices = @transform_2, window_bounds = array<i64: 1, 128>}, {transform_indices = @transform_3, window_bounds = array<i64: 512, 128>}]} {
    %c0 = arith.constant 0 : index
    %c0_0 = arith.constant 0 : index
    %0 = vector.load %arg2[%c0, %c0_0] : memref<512x9xbf16, #tpu.memory_space<vmem>>, vector<512x9xbf16>
    %c0_1 = arith.constant 0 : index
    %c0_2 = arith.constant 0 : index
    %1 = vector.load %arg3[%c0_1, %c0_2] : memref<9x128xbf16, #tpu.memory_space<vmem>>, vector<9x128xbf16>
    %cst = arith.constant dense<0.000000e+00> : vector<512x128xf32>
    %2 = tpu.matmul %0, %1, %cst {dimension_numbers = #tpu.dot_dimension_numbers<[1], [0], [0], [1], [0, 0, 1, 1], [], []>} : vector<512x9xbf16>, vector<9x128xbf16>, vector<512x128xf32> -> vector<512x128xf32>
    %c0_3 = arith.constant 0 : index
    %c0_4 = arith.constant 0 : index
    %3 = vector.load %arg4[%c0_3, %c0_4] : memref<1x128xf32, #tpu.memory_space<vmem>>, vector<1x128xf32>
    %4 = vector.broadcast %3 : vector<1x128xf32> to vector<512x128xf32>
    %5 = arith.addf %2, %4 : vector<512x128xf32>
    %cst_5 = arith.constant 0.000000e+00 : f32
    %6 = vector.broadcast %cst_5 : f32 to vector<512x128xf32>
    %7 = arith.maximumf %5, %6 : vector<512x128xf32>
    %8 = arith.truncf %7 : vector<512x128xf32> to vector<512x128xbf16>
    %c0_6 = arith.constant 0 : index
    %c0_7 = arith.constant 0 : index
    %9 = vector.load %arg5[%c0_6, %c0_7] : memref<512x128xbf16, #tpu.memory_space<vmem>>, vector<512x128xbf16>
    tpu.vector_store %arg5[%c0_6, %c0_7], %8 {strides = array<i32>} : memref<512x128xbf16, #tpu.memory_space<vmem>>, vector<512x128xbf16>,
    return
  }
  func.func @transform_0(%arg0: i32, %arg1: i32) -> (i32, i32) {
    %c0_i32 = arith.constant 0 : i32
    %c0_i32_0 = arith.constant 0 : i32
    return %arg0, %c0_i32 : i32, i32
  }
  func.func @transform_1(%arg0: i32, %arg1: i32) -> (i32, i32) {
    %c0_i32 = arith.constant 0 : i32
    %c0_i32_0 = arith.constant 0 : i32
    return %c0_i32, %arg1 : i32, i32
  }
  func.func @transform_2(%arg0: i32, %arg1: i32) -> (i32, i32) {
    %c0_i32 = arith.constant 0 : i32
    %c0_i32_0 = arith.constant 0 : i32
    return %c0_i32, %arg1 : i32, i32
  }
  func.func @transform_3(%arg0: i32, %arg1: i32) -> (i32, i32) {
    %c0_i32 = arith.constant 0 : i32
    return %arg0, %arg1 : i32, i32
  }
}

</mosaic_0001>

<bundles_post_ra>
// kernel: tpu_custom_call.1
= control target key start
LH: loop header
LB: loop body
LE: loop exit
PB: predicated region body
PF: predicated region fallthrough
CT: control target
= control target key end

     0   :  { %8 = vsyncpa [#allocation3], 0  ;;  %s2335_s0 = inlined_call_operand.vmem [shape: bf16[1024,9], index: 0, kind: input, shape index: {}]   ;;  %s2336_s1 = inlined_call_operand.vmem [shape: bf16[9,128], index: 1, kind: input, shape index: {}]   ;;  %s2337_s2 = inlined_call_operand.vmem [shape: f32[1,128], index: 2, kind: input, shape index: {}]   ;;  %s2338_s3 = inlined_call_operand.hbm [shape: bf16[1024,128], index: 3, kind: output, shape index: {}]  }
   0x1   :  { %10 = vsyncpa [#allocation3 + $0x1], 0  ;;  %s2044_s12 = smov 0   ;;  %s2046_s13 = smov 0  }
   0x2   :  { %s2048_s14 = smov 0   ;;  %s2050_s15 = smov 0  }
   0x3   :  { %s2052_s16 = smov 0   ;;  %s2054_s17 = smov 0  }
   0x4 LB: > { %s1347_s18 = sadd.s32 4294967295, %s2018_s17   ;;  %s1348_s19 = sadd.s32 4294967294, %s2018_s17   ;;  %s2018_s17 = sphi %s2054_s17, %s16_s17   ;;  %s2014_s16 = sphi %s2052_s16, %s2345_s16   ;;  %s2010_s15 = sphi %s2050_s15, %s2344_s15   ;;  %s2006_s14 = sphi %s2048_s14, %s2343_s14   ;;  %s2002_s13 = sphi %s2046_s13, %s2342_s13   ;;  %s1998_s12 = sphi %s2044_s12, %s2341_s12  }
   0x5   : > { %s28_s20 = sadd.s32 1, %s2014_s16  ;;  %s115_s21 = sadd.s32 1, %s2006_s14 }
   0x6   : > { %p30_p0 = scmp.ge.s32.totalorder %s28_s20, 2  ;;  %p125_p1 = scmp.ne.s32.totalorder %s2006_s14, %s2002_s13 }
   0x7   : > { %p126_p2 = scmp.eq.s32.totalorder %s1347_s18, 1  ;;  %p131_p3 = scmp.ne.s32.totalorder %s2002_s13, %s1998_s12 }
   0x8   : > { %s2347_s20 = smov (%p30_p0, %s28_s20), 0  ;;  %p132_p5 = scmp.eq.s32.totalorder %s1348_s19, 1 }
   0x9   : > { %p2084_p4 = por %p126_p2, %p125_p1  ;;  %s110_s23 = ssub.s32 %s2014_s16, %s2347_s20 }
   0xa   : > { %p1353_p6 = scmp.ge.s32.totalorder %s2018_s17, 1  ;;  %p113_p7 = scmp.eq.s32.totalorder %s110_s23, 0 }
   0xb   : > { %p2091_p8 = por %p132_p5, %p131_p3  ;;  %p172_p9 = scmp.lt.s32.totalorder %s2018_s17, 3 }
   0xc   : > { %s2097_s25 = scalar_select %p113_p7, %s2006_s14, %s115_s21  }
   0xd   : > { %p173_p10 = pnand %p1353_p6, %p172_p9 }
   0xe   : > { %v1907_v0 = vld [vmem:[%s2336_s1] sm:$0x1f] (!%p173_p10)   ;;  %vm553_vm0 = vcmask (!%p173_p10), 1043456   ;;  %vm554_vm1 = vcmask (!%p173_p10), 1044480   ;;  %s1355_s28 = sshll.u32 (!%p173_p10), %s2010_s15, 6  ;;  %v2020_v1 = vmov (!%p173_p10), 65535  }
   0xf   : > { %176 = sbr.rel (%p173_p10) target bundleno = 320 (0x140), region = 32  ;;  %v555_v2 = vsel (!%p173_p10), %vm553_vm0, 4294967295, %v2020_v1  ;;  %p204_p11 = scmp.lt.s32.totalorder (!%p173_p10), %s1355_s28, 127  ;;  %vm456_vm2 = vcmask (!%p173_p10), 72704   ;;  %v2175_v37 = vld [vmem:[%s2337_s2] ss:$0 sm:$0xff] (!%p173_p10) }
  0x10   : > { %v556_v3 = vsel (!%p173_p10), %vm554_vm1, %v555_v2, 0  ;;  %s200_s8 = sand.u32 (!%p173_p10), 1, %s2002_s13   ;;  %s1556_s11 = sshll.u32 (!%p173_p10), %s2010_s15, 12 }
  0x11   : > { %v558_v4 = vand.u32 (!%p173_p10), %v1907_v0, %v556_v3  ;;  %s1354_s9 = sshll.u32 (!%p173_p10), %s200_s8, 8  ;;  %s2279_s23 = scalar_lea.hbm (!%p173_p10), %s2338_s3, %s1556_s11 }
  0x12   : > { %s2188_s10 = scalar_lea.vmem (!%p173_p10), [#allocation2], %s1354_s9  ;;  %s2289_s15 = scalar_lea.sflag (!%p173_p10), [#allocation3], %s200_s8 }
  0x13   : > { %1781 = vmatprep.subr.bf16.mxu0 (!%p173_p10), %v558_v4  ;;  %1847 = vmatprep.subr.bf16.mxu1 (!%p173_p10), %v558_v4  ;;  %s1248_s18 = sshll.u32 (!%p173_p10), %s2188_s10, 4  ;;  %s2021_s27 = smov (!%p173_p10), [#allocation2]   ;;  %s2281_s18 = int_to_ptr.vmem [resolvable:$true] %s1248_s18 }
  0x14   : > { %1782 = vmatpush3.bf16.msra.mxu0 (!%p173_p10), %v558_v4  ;;  %1848 = vmatpush3.bf16.msra.mxu1 (!%p173_p10), %v558_v4  ;;  %s1940_s26 = scalar_lea.vmem (!%p173_p10), %s2281_s18, 4096 }
  0x15   : > { %p1941_p12 = scmp.ne.s32.totalorder (!%p173_p10), %s2281_s18, %s1940_s26 }
  0x16   : > { %s2349_s28 = smov (!%p204_p11, %s1355_s28), 127 }
  0x17   : > { %s1356_s29 = sshll.u32 %s2349_s28, 2  ;;  %p1942_p13 = pnand %p1941_p12, %p2084_p4 }
  0x18   : > { %s2106_s5 = scalar_lea.vmem %s2335_s0, %s1356_s29  ;;  %s1944_s28 = sshll.u32 %s2021_s27, 4  ;;  %s1945_s28 = int_to_ptr.vmem [resolvable:$false] %s1944_s28 }
  0x19   : > { %v1908_v5 = vld [vmem:[%s2106_s5] sm:$0xff]   ;;  %v1910_v7 = vld [vmem:[%s2106_s5 + $0x8] sm:$0xff]   ;;  %v1912_v9 = vld [vmem:[%s2106_s5 + $0x10] sm:$0xff]   ;;  %p1943_p0 = pneg %p1942_p13  ;;  %s1946_s29 = scalar_lea.vmem %s1945_s28, 8192 }
  0x1a   : > { %v1909_v6 = vld [vmem:[%s2106_s5 + $0x80] sm:$0xff]   ;;  %1783 = vmatprep.mubr.msk.bf16.mxu0 %vm456_vm2, %v1908_v5  ;;  %v1911_v8 = vld [vmem:[%s2106_s5 + $0x88] sm:$0xff]   ;;  %v1913_v10 = vld [vmem:[%s2106_s5 + $0x90] sm:$0xff]   ;;  %p1947_p1 = scmp.lt.s32.totalorder %s2281_s18, %s1945_s28  ;;  %p1948_p2 = scmp.lt.s32.totalorder %s1946_s29, %s1940_s26 }
  0x1b   : > { %1815 = vmatprep.mubr.msk.bf16.mxu1 %vm456_vm2, %v1909_v6  ;;  %1784 = vmatmul.mubr.msk.bf16.vlgmr.msra.gmra.mrb[0].mxu0 %vm456_vm2, %v1910_v7  ;;  %v1914_v11 = vld [vmem:[%s2106_s5 + $0x18] sm:$0xff]   ;;  %v1916_v13 = vld [vmem:[%s2106_s5 + $0x20] sm:$0xff]   ;;  %v1918_v15 = vld [vmem:[%s2106_s5 + $0x28] sm:$0xff]  }
  0x1c   : > { %1816 = vmatmul.mubr.msk.bf16.vlgmr.msra.gmra.mrb[0].mxu1 %vm456_vm2, %v1911_v8  ;;  %1787 = vmatprep.mubr.msk.bf16.mxu0 %vm456_vm2, %v1912_v9  ;;  %v1915_v12 = vld [vmem:[%s2106_s5 + $0x98] sm:$0xff]   ;;  %v1917_v14 = vld [vmem:[%s2106_s5 + $0xa0] sm:$0xff]   ;;  %v1919_v16 = vld [vmem:[%s2106_s5 + $0xa8] sm:$0xff]   ;;  %p1949_p3 = por %p1948_p2, %p1947_p1 }
  0x1d   : > { %1819 = vmatprep.mubr.msk.bf16.mxu1 %vm456_vm2, %v1913_v10  ;;  %v1920_v17 = vld [vmem:[%s2106_s5 + $0x30] sm:$0xff]   ;;  %v1922_v19 = vld [vmem:[%s2106_s5 + $0x38] sm:$0xff]   ;;  %v1924_v21 = vld [vmem:[%s2106_s5 + $0x40] sm:$0xff]  }
  0x1e   : > { %v1921_v18 = vld [vmem:[%s2106_s5 + $0xb0] sm:$0xff]   ;;  %v1923_v20 = vld [vmem:[%s2106_s5 + $0xb8] sm:$0xff]   ;;  %v1925_v22 = vld [vmem:[%s2106_s5 + $0xc0] sm:$0xff]   ;;  %p1950_p5 = pnand %p1949_p3, %p1943_p0 }
  0x1f   : > { %v1926_v23 = vld [vmem:[%s2106_s5 + $0x48] sm:$0xff]   ;;  %v1928_v25 = vld [vmem:[%s2106_s5 + $0x50] sm:$0xff]   ;;  %v1930_v27 = vld [vmem:[%s2106_s5 + $0x58] sm:$0xff]  }
  0x20   : > { %v1927_v24 = vld [vmem:[%s2106_s5 + $0xc8] sm:$0xff]   ;;  %v1929_v26 = vld [vmem:[%s2106_s5 + $0xd0] sm:$0xff]   ;;  %v1931_v28 = vld [vmem:[%s2106_s5 + $0xd8] sm:$0xff]  }
  0x21   : > { %v1932_v29 = vld [vmem:[%s2106_s5 + $0x60] sm:$0xff]   ;;  %v1934_v31 = vld [vmem:[%s2106_s5 + $0x68] sm:$0xff]   ;;  %v1936_v33 = vld [vmem:[%s2106_s5 + $0x70] sm:$0xff]  }
  0x22   : > { %v1933_v30 = vld [vmem:[%s2106_s5 + $0xe0] sm:$0xff]   ;;  %v1935_v32 = vld [vmem:[%s2106_s5 + $0xe8] sm:$0xff]   ;;  %v1937_v34 = vld [vmem:[%s2106_s5 + $0xf0] sm:$0xff]  }
  0x23   : > { %1788 = vmatmul.mubr.msk.bf16.gmra.mrb[4].mxu0 %vm456_vm2, %v1914_v11  ;;  %v1938_v35 = vld [vmem:[%s2106_s5 + $0x78] sm:$0xff]  }
  0x24   : > { %1820 = vmatmul.mubr.msk.bf16.gmra.mrb[4].mxu1 %vm456_vm2, %v1915_v12  ;;  %1791 = vmatprep.mubr.msk.bf16.mxu0 %vm456_vm2, %v1916_v13  ;;  %v1939_v36 = vld [vmem:[%s2106_s5 + $0xf8] sm:$0xff]  }
  0x25   : > { %1823 = vmatprep.mubr.msk.bf16.mxu1 %vm456_vm2, %v1917_v14 }
  0x2b   : > { %1792 = vmatmul.mubr.msk.bf16.gmra.mrb[8].mxu0 %vm456_vm2, %v1918_v15 }
  0x2c   : > { %1824 = vmatmul.mubr.msk.bf16.gmra.mrb[8].mxu1 %vm456_vm2, %v1919_v16  ;;  %1795 = vmatprep.mubr.msk.bf16.mxu0 %vm456_vm2, %v1920_v17 }
  0x2d   : > { %1827 = vmatprep.mubr.msk.bf16.mxu1 %vm456_vm2, %v1921_v18 }
  0x33   : > { %1796 = vmatmul.mubr.msk.bf16.gmra.mrb[12].mxu0 %vm456_vm2, %v1922_v19 }
  0x34   : > { %1828 = vmatmul.mubr.msk.bf16.gmra.mrb[12].mxu1 %vm456_vm2, %v1923_v20  ;;  %1799 = vmatprep.mubr.msk.bf16.mxu0 %vm456_vm2, %v1924_v21 }
  0x35   : > { %1831 = vmatprep.mubr.msk.bf16.mxu1 %vm456_vm2, %v1925_v22 }
  0x3b   : > { %1800 = vmatmul.mubr.msk.bf16.gmra.mrb[16].mxu0 %vm456_vm2, %v1926_v23 }
  0x3c   : > { %1832 = vmatmul.mubr.msk.bf16.gmra.mrb[16].mxu1 %vm456_vm2, %v1927_v24  ;;  %1803 = vmatprep.mubr.msk.bf16.mxu0 %vm456_vm2, %v1928_v25 }
  0x3d   : > { %1835 = vmatprep.mubr.msk.bf16.mxu1 %vm456_vm2, %v1929_v26 }
  0x43   : > { %1804 = vmatmul.mubr.msk.bf16.gmra.mrb[20].mxu0 %vm456_vm2, %v1930_v27 }
  0x44   : > { %1836 = vmatmul.mubr.msk.bf16.gmra.mrb[20].mxu1 %vm456_vm2, %v1931_v28  ;;  %1807 = vmatprep.mubr.msk.bf16.mxu0 %vm456_vm2, %v1932_v29 }
  0x45   : > { %1839 = vmatprep.mubr.msk.bf16.mxu1 %vm456_vm2, %v1933_v30 }
  0x4b   : > { %1808 = vmatmul.mubr.msk.bf16.gmra.mrb[24].mxu0 %vm456_vm2, %v1934_v31 }
  0x4c   : > { %1840 = vmatmul.mubr.msk.bf16.gmra.mrb[24].mxu1 %vm456_vm2, %v1935_v32  ;;  %1811 = vmatprep.mubr.msk.bf16.mxu0 %vm456_vm2, %v1936_v33 }
  0x4d   : > { %1843 = vmatprep.mubr.msk.bf16.mxu1 %vm456_vm2, %v1937_v34 }
  0x53   : > { %1812 = vmatmul.mubr.msk.bf16.gmra.mrb[28].mxu0 %vm456_vm2, %v1938_v35 }
  0x54   : > { %1844 = vmatmul.mubr.msk.bf16.gmra.mrb[28].mxu1 %vm456_vm2, %v1939_v36 }
  0xee   : > { %v1785_v38 = vpop.f32.mrb[0].mxu0 }
  0xef   : > { %v603_v39 = vadd.f32 %v1785_v38, %v2175_v37  ;;  %v1817_v40 = vpop.f32.mrb[0].mxu1  ;;  %v594_v41 = vpop.f32.mrb[1].mxu0 }
  0xf0   : > { %v731_v42 = vadd.f32 %v1817_v40, %v2175_v37  ;;  %v595_v43 = vadd.f32 %v2175_v37, %v594_v41  ;;  %v722_v44 = vpop.f32.mrb[1].mxu1  ;;  %v1786_v45 = vpop.f32.mrb[2].mxu0 }
  0xf1   : > { %v723_v46 = vadd.f32 %v2175_v37, %v722_v44  ;;  %v606_v47 = vadd.f32 %v1786_v45, %v2175_v37  ;;  %v1818_v48 = vpop.f32.mrb[2].mxu1  ;;  %v597_v49 = vpop.f32.mrb[3].mxu0  ;;  %v851_v53 = vmax.f32 %v603_v39, 0.0 }
  0xf2   : > { %v734_v50 = vadd.f32 %v1818_v48, %v2175_v37  ;;  %v598_v51 = vadd.f32 %v2175_v37, %v597_v49  ;;  %v725_v52 = vpop.f32.mrb[3].mxu1  ;;  %v883_v56 = vmax.f32 %v731_v42, 0.0  ;;  %v849_v57 = vmax.f32 %v595_v43, 0.0 }
  0xf3   : > { %v852_v54 = vmax.f32 %v606_v47, 0.0  ;;  %v726_v55 = vadd.f32 %v2175_v37, %v725_v52  ;;  %v881_v60 = vmax.f32 %v723_v46, 0.0 }
  0xf4   : > { %v884_v58 = vmax.f32 %v734_v50, 0.0  ;;  %v850_v59 = vmax.f32 %v598_v51, 0.0 }
  0xf5   : > { %v1565_v61 = vpack.c.bf16 %v852_v54, %v851_v53  ;;  %v882_v62 = vmax.f32 %v726_v55, 0.0 }
  0xf6   : > { %v1645_v63 = vpack.c.bf16 %v884_v58, %v883_v56  ;;  %v1560_v0 = vpack.c.bf16 %v850_v59, %v849_v57  ;;  %v1789_v1 = vpop.f32.mrb[4].mxu0 }
  0xf7   : > { %1717 = vst [vmem:[%s2188_s10 + $0x8] sm:$0xff] %v1565_v61   ;;  %v1640_v2 = vpack.c.bf16 %v882_v62, %v881_v60  ;;  %v619_v3 = vadd.f32 %v1789_v1, %v2175_v37  ;;  %v1821_v4 = vpop.f32.mrb[4].mxu1  ;;  %v610_v5 = vpop.f32.mrb[5].mxu0 }
  0xf8   : > { %1733 = vst [vmem:[%s2188_s10 + $0x88] sm:$0xff] %v1645_v63   ;;  %1561 = vst [vmem:[%s2188_s10] sm:$0xff] %v1560_v0   ;;  %v747_v6 = vadd.f32 %v1821_v4, %v2175_v37  ;;  %v611_v7 = vadd.f32 %v2175_v37, %v610_v5  ;;  %v738_v8 = vpop.f32.mrb[5].mxu1  ;;  %v1790_v9 = vpop.f32.mrb[6].mxu0 }
  0xf9   : > { %1732 = vst [vmem:[%s2188_s10 + $0x80] sm:$0xff] %v1640_v2   ;;  %v739_v10 = vadd.f32 %v2175_v37, %v738_v8  ;;  %v622_v11 = vadd.f32 %v1790_v9, %v2175_v37  ;;  %v1822_v12 = vpop.f32.mrb[6].mxu1  ;;  %v613_v13 = vpop.f32.mrb[7].mxu0  ;;  %v855_v17 = vmax.f32 %v619_v3, 0.0 }
  0xfa   : > { %v750_v14 = vadd.f32 %v1822_v12, %v2175_v37  ;;  %v614_v15 = vadd.f32 %v2175_v37, %v613_v13  ;;  %v741_v16 = vpop.f32.mrb[7].mxu1  ;;  %v887_v20 = vmax.f32 %v747_v6, 0.0  ;;  %v853_v21 = vmax.f32 %v611_v7, 0.0 }
  0xfb   : > { %v856_v18 = vmax.f32 %v622_v11, 0.0  ;;  %v742_v19 = vadd.f32 %v2175_v37, %v741_v16  ;;  %v885_v24 = vmax.f32 %v739_v10, 0.0 }
  0xfc   : > { %v888_v22 = vmax.f32 %v750_v14, 0.0  ;;  %v854_v23 = vmax.f32 %v614_v15, 0.0 }
  0xfd   : > { %v1575_v25 = vpack.c.bf16 %v856_v18, %v855_v17  ;;  %v886_v26 = vmax.f32 %v742_v19, 0.0 }
  0xfe   : > { %v1655_v27 = vpack.c.bf16 %v888_v22, %v887_v20  ;;  %v1570_v28 = vpack.c.bf16 %v854_v23, %v853_v21  ;;  %v1793_v29 = vpop.f32.mrb[8].mxu0 }
  0xff   : > { %1719 = vst [vmem:[%s2188_s10 + $0x18] sm:$0xff] %v1575_v25   ;;  %v1650_v30 = vpack.c.bf16 %v886_v26, %v885_v24  ;;  %v635_v31 = vadd.f32 %v1793_v29, %v2175_v37  ;;  %v1825_v32 = vpop.f32.mrb[8].mxu1  ;;  %v626_v33 = vpop.f32.mrb[9].mxu0 }
 0x100   : > { %1735 = vst [vmem:[%s2188_s10 + $0x98] sm:$0xff] %v1655_v27   ;;  %1718 = vst [vmem:[%s2188_s10 + $0x10] sm:$0xff] %v1570_v28   ;;  %v763_v34 = vadd.f32 %v1825_v32, %v2175_v37  ;;  %v627_v35 = vadd.f32 %v2175_v37, %v626_v33  ;;  %v754_v36 = vpop.f32.mrb[9].mxu1  ;;  %v1794_v38 = vpop.f32.mrb[10].mxu0 }
 0x101   : > { %1734 = vst [vmem:[%s2188_s10 + $0x90] sm:$0xff] %v1650_v30   ;;  %v755_v39 = vadd.f32 %v2175_v37, %v754_v36  ;;  %v638_v40 = vadd.f32 %v1794_v38, %v2175_v37  ;;  %v1826_v41 = vpop.f32.mrb[10].mxu1  ;;  %v629_v42 = vpop.f32.mrb[11].mxu0  ;;  %v859_v46 = vmax.f32 %v635_v31, 0.0 }
 0x102   : > { %v766_v43 = vadd.f32 %v1826_v41, %v2175_v37  ;;  %v630_v44 = vadd.f32 %v2175_v37, %v629_v42  ;;  %v757_v45 = vpop.f32.mrb[11].mxu1  ;;  %v891_v49 = vmax.f32 %v763_v34, 0.0  ;;  %v857_v50 = vmax.f32 %v627_v35, 0.0 }
 0x103   : > { %v860_v47 = vmax.f32 %v638_v40, 0.0  ;;  %v758_v48 = vadd.f32 %v2175_v37, %v757_v45  ;;  %v889_v53 = vmax.f32 %v755_v39, 0.0 }
 0x104   : > { %v892_v51 = vmax.f32 %v766_v43, 0.0  ;;  %v858_v52 = vmax.f32 %v630_v44, 0.0 }
 0x105   : > { %v1585_v54 = vpack.c.bf16 %v860_v47, %v859_v46  ;;  %v890_v55 = vmax.f32 %v758_v48, 0.0 }
 0x106   : > { %v1665_v56 = vpack.c.bf16 %v892_v51, %v891_v49  ;;  %v1580_v57 = vpack.c.bf16 %v858_v52, %v857_v50  ;;  %v1797_v58 = vpop.f32.mrb[12].mxu0 }
 0x107   : > { %1721 = vst [vmem:[%s2188_s10 + $0x28] sm:$0xff] %v1585_v54   ;;  %v1660_v59 = vpack.c.bf16 %v890_v55, %v889_v53  ;;  %v651_v60 = vadd.f32 %v1797_v58, %v2175_v37  ;;  %v1829_v61 = vpop.f32.mrb[12].mxu1  ;;  %v642_v62 = vpop.f32.mrb[13].mxu0 }
 0x108   : > { %1737 = vst [vmem:[%s2188_s10 + $0xa8] sm:$0xff] %v1665_v56   ;;  %1720 = vst [vmem:[%s2188_s10 + $0x20] sm:$0xff] %v1580_v57   ;;  %v779_v63 = vadd.f32 %v1829_v61, %v2175_v37  ;;  %v643_v0 = vadd.f32 %v2175_v37, %v642_v62  ;;  %v770_v1 = vpop.f32.mrb[13].mxu1  ;;  %v1798_v2 = vpop.f32.mrb[14].mxu0 }
 0x109   : > { %1736 = vst [vmem:[%s2188_s10 + $0xa0] sm:$0xff] %v1660_v59   ;;  %v771_v3 = vadd.f32 %v2175_v37, %v770_v1  ;;  %v654_v4 = vadd.f32 %v1798_v2, %v2175_v37  ;;  %v1830_v5 = vpop.f32.mrb[14].mxu1  ;;  %v645_v6 = vpop.f32.mrb[15].mxu0  ;;  %v863_v10 = vmax.f32 %v651_v60, 0.0 }
 0x10a   : > { %v782_v7 = vadd.f32 %v1830_v5, %v2175_v37  ;;  %v646_v8 = vadd.f32 %v2175_v37, %v645_v6  ;;  %v773_v9 = vpop.f32.mrb[15].mxu1  ;;  %v895_v13 = vmax.f32 %v779_v63, 0.0  ;;  %v861_v14 = vmax.f32 %v643_v0, 0.0 }
 0x10b   : > { %v864_v11 = vmax.f32 %v654_v4, 0.0  ;;  %v774_v12 = vadd.f32 %v2175_v37, %v773_v9  ;;  %v893_v17 = vmax.f32 %v771_v3, 0.0 }
 0x10c   : > { %v896_v15 = vmax.f32 %v782_v7, 0.0  ;;  %v862_v16 = vmax.f32 %v646_v8, 0.0 }
 0x10d   : > { %v1595_v18 = vpack.c.bf16 %v864_v11, %v863_v10  ;;  %v894_v19 = vmax.f32 %v774_v12, 0.0 }
 0x10e   : > { %v1675_v20 = vpack.c.bf16 %v896_v15, %v895_v13  ;;  %v1590_v21 = vpack.c.bf16 %v862_v16, %v861_v14  ;;  %v1801_v22 = vpop.f32.mrb[16].mxu0 }
 0x10f   : > { %1723 = vst [vmem:[%s2188_s10 + $0x38] sm:$0xff] %v1595_v18   ;;  %v1670_v23 = vpack.c.bf16 %v894_v19, %v893_v17  ;;  %v667_v24 = vadd.f32 %v1801_v22, %v2175_v37  ;;  %v1833_v25 = vpop.f32.mrb[16].mxu1  ;;  %v658_v26 = vpop.f32.mrb[17].mxu0 }
 0x110   : > { %1739 = vst [vmem:[%s2188_s10 + $0xb8] sm:$0xff] %v1675_v20   ;;  %1722 = vst [vmem:[%s2188_s10 + $0x30] sm:$0xff] %v1590_v21   ;;  %v795_v27 = vadd.f32 %v1833_v25, %v2175_v37  ;;  %v659_v28 = vadd.f32 %v2175_v37, %v658_v26  ;;  %v786_v29 = vpop.f32.mrb[17].mxu1  ;;  %v1802_v30 = vpop.f32.mrb[18].mxu0 }
 0x111   : > { %1738 = vst [vmem:[%s2188_s10 + $0xb0] sm:$0xff] %v1670_v23   ;;  %v787_v31 = vadd.f32 %v2175_v37, %v786_v29  ;;  %v670_v32 = vadd.f32 %v1802_v30, %v2175_v37  ;;  %v1834_v33 = vpop.f32.mrb[18].mxu1  ;;  %v661_v34 = vpop.f32.mrb[19].mxu0  ;;  %v867_v39 = vmax.f32 %v667_v24, 0.0 }
 0x112   : > { %v798_v35 = vadd.f32 %v1834_v33, %v2175_v37  ;;  %v662_v36 = vadd.f32 %v2175_v37, %v661_v34  ;;  %v789_v38 = vpop.f32.mrb[19].mxu1  ;;  %v899_v42 = vmax.f32 %v795_v27, 0.0  ;;  %v865_v43 = vmax.f32 %v659_v28, 0.0 }
 0x113   : > { %v868_v40 = vmax.f32 %v670_v32, 0.0  ;;  %v790_v41 = vadd.f32 %v2175_v37, %v789_v38  ;;  %v897_v46 = vmax.f32 %v787_v31, 0.0 }
 0x114   : > { %v900_v44 = vmax.f32 %v798_v35, 0.0  ;;  %v866_v45 = vmax.f32 %v662_v36, 0.0 }
 0x115   : > { %v1605_v47 = vpack.c.bf16 %v868_v40, %v867_v39  ;;  %v898_v48 = vmax.f32 %v790_v41, 0.0 }
 0x116   : > { %v1685_v49 = vpack.c.bf16 %v900_v44, %v899_v42  ;;  %v1600_v50 = vpack.c.bf16 %v866_v45, %v865_v43  ;;  %v1805_v51 = vpop.f32.mrb[20].mxu0 }
 0x117   : > { %1725 = vst [vmem:[%s2188_s10 + $0x48] sm:$0xff] %v1605_v47   ;;  %v1680_v52 = vpack.c.bf16 %v898_v48, %v897_v46  ;;  %v683_v53 = vadd.f32 %v1805_v51, %v2175_v37  ;;  %v1837_v54 = vpop.f32.mrb[20].mxu1  ;;  %v674_v55 = vpop.f32.mrb[21].mxu0 }
 0x118   : > { %1741 = vst [vmem:[%s2188_s10 + $0xc8] sm:$0xff] %v1685_v49   ;;  %1724 = vst [vmem:[%s2188_s10 + $0x40] sm:$0xff] %v1600_v50   ;;  %v811_v56 = vadd.f32 %v1837_v54, %v2175_v37  ;;  %v675_v57 = vadd.f32 %v2175_v37, %v674_v55  ;;  %v802_v58 = vpop.f32.mrb[21].mxu1  ;;  %v1806_v59 = vpop.f32.mrb[22].mxu0 }
 0x119   : > { %1740 = vst [vmem:[%s2188_s10 + $0xc0] sm:$0xff] %v1680_v52   ;;  %v803_v60 = vadd.f32 %v2175_v37, %v802_v58  ;;  %v686_v61 = vadd.f32 %v1806_v59, %v2175_v37  ;;  %v1838_v62 = vpop.f32.mrb[22].mxu1  ;;  %v677_v63 = vpop.f32.mrb[23].mxu0  ;;  %v871_v3 = vmax.f32 %v683_v53, 0.0 }
 0x11a   : > { %v814_v0 = vadd.f32 %v1838_v62, %v2175_v37  ;;  %v678_v1 = vadd.f32 %v2175_v37, %v677_v63  ;;  %v805_v2 = vpop.f32.mrb[23].mxu1  ;;  %v903_v6 = vmax.f32 %v811_v56, 0.0  ;;  %v869_v7 = vmax.f32 %v675_v57, 0.0 }
 0x11b   : > { %v872_v4 = vmax.f32 %v686_v61, 0.0  ;;  %v806_v5 = vadd.f32 %v2175_v37, %v805_v2  ;;  %v901_v10 = vmax.f32 %v803_v60, 0.0 }
 0x11c   : > { %v904_v8 = vmax.f32 %v814_v0, 0.0  ;;  %v870_v9 = vmax.f32 %v678_v1, 0.0 }
 0x11d   : > { %v1615_v11 = vpack.c.bf16 %v872_v4, %v871_v3  ;;  %v902_v12 = vmax.f32 %v806_v5, 0.0 }
 0x11e   : > { %v1695_v13 = vpack.c.bf16 %v904_v8, %v903_v6  ;;  %v1610_v14 = vpack.c.bf16 %v870_v9, %v869_v7  ;;  %v1809_v15 = vpop.f32.mrb[24].mxu0 }
 0x11f   : > { %1727 = vst [vmem:[%s2188_s10 + $0x58] sm:$0xff] %v1615_v11   ;;  %v1690_v16 = vpack.c.bf16 %v902_v12, %v901_v10  ;;  %v699_v17 = vadd.f32 %v1809_v15, %v2175_v37  ;;  %v1841_v18 = vpop.f32.mrb[24].mxu1  ;;  %v690_v19 = vpop.f32.mrb[25].mxu0 }
 0x120   : > { %1743 = vst [vmem:[%s2188_s10 + $0xd8] sm:$0xff] %v1695_v13   ;;  %1726 = vst [vmem:[%s2188_s10 + $0x50] sm:$0xff] %v1610_v14   ;;  %v827_v20 = vadd.f32 %v1841_v18, %v2175_v37  ;;  %v691_v21 = vadd.f32 %v2175_v37, %v690_v19  ;;  %v818_v22 = vpop.f32.mrb[25].mxu1  ;;  %v1810_v23 = vpop.f32.mrb[26].mxu0 }
 0x121   : > { %1742 = vst [vmem:[%s2188_s10 + $0xd0] sm:$0xff] %v1690_v16   ;;  %v819_v24 = vadd.f32 %v2175_v37, %v818_v22  ;;  %v702_v25 = vadd.f32 %v1810_v23, %v2175_v37  ;;  %v1842_v26 = vpop.f32.mrb[26].mxu1  ;;  %v693_v27 = vpop.f32.mrb[27].mxu0  ;;  %v875_v31 = vmax.f32 %v699_v17, 0.0 }
 0x122   : > { %v830_v28 = vadd.f32 %v1842_v26, %v2175_v37  ;;  %v694_v29 = vadd.f32 %v2175_v37, %v693_v27  ;;  %v821_v30 = vpop.f32.mrb[27].mxu1  ;;  %v907_v34 = vmax.f32 %v827_v20, 0.0  ;;  %v873_v35 = vmax.f32 %v691_v21, 0.0 }
 0x123   : > { %v876_v32 = vmax.f32 %v702_v25, 0.0  ;;  %v822_v33 = vadd.f32 %v2175_v37, %v821_v30  ;;  %v905_v39 = vmax.f32 %v819_v24, 0.0 }
 0x124   : > { %v908_v36 = vmax.f32 %v830_v28, 0.0  ;;  %v874_v38 = vmax.f32 %v694_v29, 0.0 }
 0x125   : > { %v1625_v40 = vpack.c.bf16 %v876_v32, %v875_v31  ;;  %v906_v41 = vmax.f32 %v822_v33, 0.0 }
 0x126   : > { %v1705_v42 = vpack.c.bf16 %v908_v36, %v907_v34  ;;  %v1620_v43 = vpack.c.bf16 %v874_v38, %v873_v35  ;;  %v1813_v44 = vpop.f32.mrb[28].mxu0 }
 0x127   : > { %1729 = vst [vmem:[%s2188_s10 + $0x68] sm:$0xff] %v1625_v40   ;;  %v1700_v45 = vpack.c.bf16 %v906_v41, %v905_v39  ;;  %v715_v46 = vadd.f32 %v1813_v44, %v2175_v37  ;;  %v1845_v47 = vpop.f32.mrb[28].mxu1  ;;  %v706_v48 = vpop.f32.mrb[29].mxu0 }
 0x128   : > { %1745 = vst [vmem:[%s2188_s10 + $0xe8] sm:$0xff] %v1705_v42   ;;  %1728 = vst [vmem:[%s2188_s10 + $0x60] sm:$0xff] %v1620_v43   ;;  %v843_v49 = vadd.f32 %v1845_v47, %v2175_v37  ;;  %v707_v50 = vadd.f32 %v2175_v37, %v706_v48  ;;  %v834_v51 = vpop.f32.mrb[29].mxu1  ;;  %v1814_v52 = vpop.f32.mrb[30].mxu0 }
 0x129   : > { %1744 = vst [vmem:[%s2188_s10 + $0xe0] sm:$0xff] %v1700_v45   ;;  %v835_v53 = vadd.f32 %v2175_v37, %v834_v51  ;;  %v718_v54 = vadd.f32 %v1814_v52, %v2175_v37  ;;  %v1846_v55 = vpop.f32.mrb[30].mxu1  ;;  %v709_v56 = vpop.f32.mrb[31].mxu0  ;;  %v879_v60 = vmax.f32 %v715_v46, 0.0 }
 0x12a   : > { %v846_v57 = vadd.f32 %v1846_v55, %v2175_v37  ;;  %v710_v58 = vadd.f32 %v2175_v37, %v709_v56  ;;  %v837_v59 = vpop.f32.mrb[31].mxu1  ;;  %v911_v63 = vmax.f32 %v843_v49, 0.0  ;;  %v877_v0 = vmax.f32 %v707_v50, 0.0 }
 0x12b   : > { %v880_v61 = vmax.f32 %v718_v54, 0.0  ;;  %v838_v62 = vadd.f32 %v2175_v37, %v837_v59  ;;  %v909_v3 = vmax.f32 %v835_v53, 0.0 }
 0x12c   : > { %v912_v1 = vmax.f32 %v846_v57, 0.0  ;;  %v878_v2 = vmax.f32 %v710_v58, 0.0 }
 0x12d   : > { %v1635_v4 = vpack.c.bf16 %v880_v61, %v879_v60  ;;  %v910_v5 = vmax.f32 %v838_v62, 0.0 }
 0x12e   : > { %v1715_v6 = vpack.c.bf16 %v912_v1, %v911_v63  ;;  %v1630_v7 = vpack.c.bf16 %v878_v2, %v877_v0 }
 0x12f   : > { %1731 = vst [vmem:[%s2188_s10 + $0x78] sm:$0xff] %v1635_v4   ;;  %v1710_v37 = vpack.c.bf16 %v910_v5, %v909_v3 }
 0x130   : > { %1747 = vst [vmem:[%s2188_s10 + $0xf8] sm:$0xff] %v1715_v6   ;;  %1730 = vst [vmem:[%s2188_s10 + $0x70] sm:$0xff] %v1630_v7  }
 0x131   : > { %1746 = vst [vmem:[%s2188_s10 + $0xf0] sm:$0xff] %v1710_v37  }
 0x132   : > { %1953 = shalt.err (!%p1950_p5)
}
 0x133   : > { %s1954_s30 = scalar_lea.hbm %s2279_s23, 4096  ;;  %s1958_s6 = scalar_lea.hbm %s2338_s3, 8192 }
 0x134   : > { %p1955_p6 = scmp.ne.s32.totalorder %s2279_s23, %s1954_s30  ;;  %p1959_p10 = scmp.lt.u32.totalorder %s2279_s23, %s2338_s3 }
 0x135   : > { %p1960_p11 = scmp.lt.u32.totalorder %s1958_s6, %s1954_s30  ;;  %p1962_p13 = scmp.lt.u32.totalorder %s1954_s30, %s2279_s23 }
 0x136   : > { %p1956_p7 = pnand %p1955_p6, %p2084_p4 }
 0x137   : > { %p1961_p12 = por %p1960_p11, %p1959_p10 }
 0x138   : > { %p1957_p9 = pneg %p1956_p7 }
 0x139   : > { %p1963_p0 = por %p1962_p13, %p1961_p12 }
 0x13b   : > { %p1964_p1 = pnand %p1963_p0, %p1957_p9 }
 0x13d   : > { %1967 = shalt.err (!%p1964_p1)
}
 0x13e   : > { %s2022_s9 = smov 64   ;;  %s2023_s10 = smov 4  }
 0x13f   : > { %1849 = dma.vmem_to_hbm [thread:$0]  (%p2084_p4), %s2281_s18, 4096, %s2279_s23, %s2289_s15, %s2022_s9, %s2022_s9, %s2023_s10  }
 0x140 PF: > { %p1855_p2 = scmp.ge.s32.totalorder %s2018_s17, 2  ;;  %s1263_s11 = sand.u32 1, %s1998_s12  }
 0x141   : > { %s1264_s19 = scalar_lea.sflag [#allocation3], %s1263_s11 }
 0x142   : > { %p1852_p3 = pnand %p1855_p2, %p2091_p8 }
 0x144   : > { %1993 = dma.done.wait (!%p1852_p3), %s1264_s19, 4096  }
 0x145   : > { %1995 = vsyncadd (!%p1852_p3), %s1264_s19, 4294963200  ;;  %s16_s17 = sadd.s32 1, %s2018_s17   ;;  %s2341_s12 = smov %s2002_s13 }
 0x146   : > { %p13_p5 = scmp.ge.s32.totalorder %s16_s17, 4   ;;  %s2342_s13 = smov %s2006_s14 }
 0x147   : > { %s2343_s14 = smov %s2097_s25  ;;  %s2344_s15 = smov %s2014_s16 }
 0x148   : > { %s2345_s16 = smov %s2347_s20  ;;  %15 = sbr.rel (!%p13_p5) target bundleno = 4 (0x4), region = 73 }
 0x14f   :  { %1269 = vsyncpa [#allocation3], 1 }
 0x150   :  { %1271 = vsyncpa [#allocation3 + $0x1], 1 }

</bundles_post_ra>
